<compile_context>
chip_gen: v6e
topology: v6e:2x2x1
jax: 0.10.0
libtpu: 0.0.40
codegen_flags: <defaults>
</compile_context>

<pallas_src>
import jax
import jax.numpy as jnp
from jax.experimental import pallas as pl
from jax.experimental.pallas import tpu as pltpu


def _round_up(x, m):
    return (x + m - 1) // m * m


def _adapter_kernel(x_ref, wd_ref, bd_ref, wu_ref, bu_ref, o_ref):
    # x_ref: (tile_n, dim)   wd_ref: (dim, bot)    bd_ref: (1, bot)  f32
    # wu_ref: (bot, dim)     bu_ref: (1, dim) f32  o_ref: (tile_n, dim)
    x = x_ref[...]
    h = jnp.dot(x, wd_ref[...], preferred_element_type=jnp.float32) + bd_ref[...]
    h = jnp.maximum(h, 0.0)                 # ReLU (VPU; hidden under DMA/MXU)
    h = h.astype(wu_ref.dtype)              # feed MXU at native weight rate
    y = jnp.dot(h, wu_ref[...], preferred_element_type=jnp.float32) + bu_ref[...]
    o_ref[...] = y.astype(o_ref.dtype)


def _vmem_estimate(tile_n, dim, bot, a_item, w_item, w_bufs):
    """Per-grid-step VMEM use: double-buffered x/out tiles, resident weights,
    and the f32 intermediates (h and the pre-cast y) Mosaic materializes."""
    io = 4 * tile_n * dim * a_item                  # 2x-buffered x + out tiles
    weights = w_bufs * 2 * dim * bot * w_item       # W_down + W_up
    biases = w_bufs * (dim + bot) * 4               # negligible
    scratch = tile_n * bot * 4 + tile_n * dim * 4   # f32 h + f32 y
    return io + weights + biases + scratch


def _physical_vmem_bytes():
    try:
        return int(pltpu.get_tpu_info().vmem_capacity_bytes)
    except Exception:
        return 64 * 1024 * 1024   # conservative fallback (v7x per-TC VMEM)


def adapter_forward(x, w_down, b_down, w_up, b_up, *, tile_rows=1024):
    """x: (..., dim).  w_down: (dim, bottleneck) [transposed vs. torch],
    b_down: (bottleneck,), w_up: (bottleneck, dim), b_up: (dim,)."""
    orig_shape = x.shape
    dim = orig_shape[-1]
    bot = w_down.shape[1]
    x2d = x.reshape(-1, dim)                 # metadata-only reshape
    n = x2d.shape[0]

    act_dtype = x.dtype
    w_dtype = w_down.dtype
    a_item = jnp.dtype(act_dtype).itemsize
    w_item = jnp.dtype(w_dtype).itemsize

    # Biases as f32 (1, features) rows (tiny, no meaningful HBM traffic).
    bd = b_down.astype(jnp.float32).reshape(1, bot)
    bu = b_up.astype(jnp.float32).reshape(1, dim)

    # ---- generation-aware tile sizing: budget ~75% of physical VMEM -------
    # (~96 MiB on v5e/v6e's 128 MiB, ~48 MiB on v7x's 64 MiB per-TC VMEM).
    budget = (3 * _physical_vmem_bytes()) // 4
    tile_n = _round_up(min(tile_rows, _round_up(max(n, 1), 8)), 8)
    while tile_n > 8 and _vmem_estimate(tile_n, dim, bot, a_item, w_item, 1) > budget:
        tile_n = max(8, _round_up(tile_n // 2, 8))

    # Megacore (v7x): make sure both TensorCores get at least one grid step
    # (harmless extra step on v5e/v6e).
    if n > 8 and pl.cdiv(n, tile_n) < 2:
        tile_n = _round_up(pl.cdiv(n, 2), 8)

    grid = (pl.cdiv(n, tile_n),)

    # Scoped VMEM limit: estimate (conservatively with double-buffered weights,
    # in case the single-buffer request falls back) + 25% + 2 MiB headroom,
    # never above the budget so v7x keeps compiler-scratch room.
    est_hi = _vmem_estimate(tile_n, dim, bot, a_item, w_item, 2)
    vmem_limit = int(min(budget, max(32 * 1024 * 1024,
                                     est_hi + est_hi // 4 + (2 << 20))))

    # Scheduler hint for XLA around the custom call (actual, unpadded sizes).
    cost = pl.CostEstimate(
        flops=4 * n * dim * bot,                       # two matmuls, 2*M*N*K each
        transcendentals=0,
        bytes_accessed=(2 * n * dim * a_item           # x in + y out
                        + 2 * dim * bot * w_item       # both weight matrices
                        + (dim + bot) * 4),            # biases
    )

    def build(single_buffer_weights):
        if single_buffer_weights:
            def wspec(shape):
                return pl.BlockSpec(shape, lambda i: (0, 0),
                                    pipeline_mode=pl.Buffered(1))
        else:
            def wspec(shape):
                return pl.BlockSpec(shape, lambda i: (0, 0))
        return pl.pallas_call(
            _adapter_kernel,
            out_shape=jax.ShapeDtypeStruct((n, dim), act_dtype),
            grid_spec=pl.GridSpec(
                grid=grid,
                in_specs=[
                    pl.BlockSpec((tile_n, dim), lambda i: (i, 0)),  # x tile (streamed)
                    wspec((dim, bot)),                              # W_down (resident)
                    wspec((1, bot)),                                # b_down (resident)
                    wspec((bot, dim)),                              # W_up   (resident)
                    wspec((1, dim)),                                # b_up   (resident)
                ],
                out_specs=pl.BlockSpec((tile_n, dim), lambda i: (i, 0)),
            ),
            compiler_params=pltpu.CompilerParams(
                dimension_semantics=("parallel",),   # rows independent -> v7x megacore
                vmem_limit_bytes=vmem_limit,
            ),
            cost_estimate=cost,
        )

    try:
        out = build(True)(x2d, w_down, bd, w_up, bu)
    except Exception:
        # Fallback for JAX versions that reject Buffered(1) on pipelined inputs.
        out = build(False)(x2d, w_down, bd, w_up, bu)

    return out.reshape(orig_shape)


def init_adapter_params(key, dim, bottleneck=64, dtype=jnp.float32):
    """Deterministic init mimicking nn.Linear default (uniform +/- 1/sqrt(fan_in)).
    Weights are stored transposed relative to PyTorch: (in_features, out_features)."""
    k1, k2, k3, k4 = jax.random.split(key, 4)
    bound_d = 1.0 / jnp.sqrt(dim)
    bound_u = 1.0 / jnp.sqrt(bottleneck)
    w_down = jax.random.uniform(k1, (dim, bottleneck), dtype, -bound_d, bound_d)
    b_down = jax.random.uniform(k2, (bottleneck,), dtype, -bound_d, bound_d)
    w_up = jax.random.uniform(k3, (bottleneck, dim), dtype, -bound_u, bound_u)
    b_up = jax.random.uniform(k4, (dim,), dtype, -bound_u, bound_u)
    return w_down, b_down, w_up, b_up


if __name__ == "__main__":
    key = jax.random.PRNGKey(0)
    k_x, k_p = jax.random.split(key)

    batch, seq, dim = 2, 8, 32
    bottleneck = 64

    x = jax.random.normal(k_x, (batch, seq, dim), dtype=jnp.float32)
    w_down, b_down, w_up, b_up = init_adapter_params(k_p, dim, bottleneck)

    y = adapter_forward(x, w_down, b_down, w_up, b_up)
    y = jax.block_until_ready(y)

    # Reference check (plain JAX) for sanity.
    h_ref = jnp.maximum(x.reshape(-1, dim) @ w_down + b_down, 0.0)
    y_ref = (h_ref @ w_up + b_up).reshape(batch, seq, dim)
    assert y.shape == (batch, seq, dim)
    assert jnp.allclose(y, y_ref, atol=1e-5, rtol=1e-5)

    print("KERNEL_OK")
</pallas_src>

<mosaic_0001>
module attributes {stable_mosaic.version = 11 : i64} {
  func.func @_adapter_kernel(%arg0: i32, %arg1: memref<8x32xf32, #tpu.memory_space<vmem>>, %arg2: memref<32x64xf32, #tpu.memory_space<vmem>>, %arg3: memref<1x64xf32, #tpu.memory_space<vmem>>, %arg4: memref<64x32xf32, #tpu.memory_space<vmem>>, %arg5: memref<1x32xf32, #tpu.memory_space<vmem>>, %arg6: memref<8x32xf32, #tpu.memory_space<vmem>>) attributes {dimension_semantics = [#tpu.dimension_semantics<parallel>], iteration_bounds = array<i64: 2>, scalar_prefetch = 0 : i64, scratch_operands = 0 : i64, tpu.core_type = #tpu.core_type<tc>, window_params = [{transform_indices = @transform_0, window_bounds = array<i64: 8, 32>}, {pipeline_mode = #tpu.pipeline_mode<synchronous>, transform_indices = @transform_1, window_bounds = array<i64: 32, 64>}, {pipeline_mode = #tpu.pipeline_mode<synchronous>, transform_indices = @transform_2, window_bounds = array<i64: 1, 64>}, {pipeline_mode = #tpu.pipeline_mode<synchronous>, transform_indices = @transform_3, window_bounds = array<i64: 64, 32>}, {pipeline_mode = #tpu.pipeline_mode<synchronous>, transform_indices = @transform_4, window_bounds = array<i64: 1, 32>}, {transform_indices = @transform_5, window_bounds = array<i64: 8, 32>}]} {
    %c0 = arith.constant 0 : index
    %c0_0 = arith.constant 0 : index
    %0 = vector.load %arg1[%c0, %c0_0] : memref<8x32xf32, #tpu.memory_space<vmem>>, vector<8x32xf32>
    %c0_1 = arith.constant 0 : index
    %c0_2 = arith.constant 0 : index
    %1 = vector.load %arg2[%c0_1, %c0_2] : memref<32x64xf32, #tpu.memory_space<vmem>>, vector<32x64xf32>
    %cst = arith.constant dense<0.000000e+00> : vector<8x64xf32>
    %2 = tpu.matmul %0, %1, %cst {dimension_numbers = #tpu.dot_dimension_numbers<[1], [0], [0], [1], [0, 0, 1, 1], [], []>} : vector<8x32xf32>, vector<32x64xf32>, vector<8x64xf32> -> vector<8x64xf32>
    %c0_3 = arith.constant 0 : index
    %c0_4 = arith.constant 0 : index
    %3 = vector.load %arg3[%c0_3, %c0_4] : memref<1x64xf32, #tpu.memory_space<vmem>>, vector<1x64xf32>
    %4 = vector.broadcast %3 : vector<1x64xf32> to vector<8x64xf32>
    %5 = arith.addf %2, %4 : vector<8x64xf32>
    %cst_5 = arith.constant 0.000000e+00 : f32
    %6 = vector.broadcast %cst_5 : f32 to vector<8x64xf32>
    %7 = arith.maximumf %5, %6 : vector<8x64xf32>
    %c0_6 = arith.constant 0 : index
    %c0_7 = arith.constant 0 : index
    %8 = vector.load %arg4[%c0_6, %c0_7] : memref<64x32xf32, #tpu.memory_space<vmem>>, vector<64x32xf32>
    %cst_8 = arith.constant dense<0.000000e+00> : vector<8x32xf32>
    %9 = tpu.matmul %7, %8, %cst_8 {dimension_numbers = #tpu.dot_dimension_numbers<[1], [0], [0], [1], [0, 0, 1, 1], [], []>} : vector<8x64xf32>, vector<64x32xf32>, vector<8x32xf32> -> vector<8x32xf32>
    %c0_9 = arith.constant 0 : index
    %c0_10 = arith.constant 0 : index
    %10 = vector.load %arg5[%c0_9, %c0_10] : memref<1x32xf32, #tpu.memory_space<vmem>>, vector<1x32xf32>
    %11 = vector.broadcast %10 : vector<1x32xf32> to vector<8x32xf32>
    %12 = arith.addf %9, %11 : vector<8x32xf32>
    %c0_11 = arith.constant 0 : index
    %c0_12 = arith.constant 0 : index
    %13 = vector.load %arg6[%c0_11, %c0_12] : memref<8x32xf32, #tpu.memory_space<vmem>>, vector<8x32xf32>
    tpu.vector_store %arg6[%c0_11, %c0_12], %12 {strides = array<i32>} : memref<8x32xf32, #tpu.memory_space<vmem>>, vector<8x32xf32>,
    return
  }
  func.func @transform_0(%arg0: i32) -> (i32, i32) {
    %c0_i32 = arith.constant 0 : i32
    %c0_i32_0 = arith.constant 0 : i32
    return %arg0, %c0_i32 : i32, i32
  }
  func.func @transform_1(%arg0: i32) -> (i32, i32) {
    %c0_i32 = arith.constant 0 : i32
    %c0_i32_0 = arith.constant 0 : i32
    %c0_i32_1 = arith.constant 0 : i32
    return %c0_i32, %c0_i32_0 : i32, i32
  }
  func.func @transform_2(%arg0: i32) -> (i32, i32) {
    %c0_i32 = arith.constant 0 : i32
    %c0_i32_0 = arith.constant 0 : i32
    %c0_i32_1 = arith.constant 0 : i32
    return %c0_i32, %c0_i32_0 : i32, i32
  }
  func.func @transform_3(%arg0: i32) -> (i32, i32) {
    %c0_i32 = arith.constant 0 : i32
    %c0_i32_0 = arith.constant 0 : i32
    %c0_i32_1 = arith.constant 0 : i32
    return %c0_i32, %c0_i32_0 : i32, i32
  }
  func.func @transform_4(%arg0: i32) -> (i32, i32) {
    %c0_i32 = arith.constant 0 : i32
    %c0_i32_0 = arith.constant 0 : i32
    %c0_i32_1 = arith.constant 0 : i32
    return %c0_i32, %c0_i32_0 : i32, i32
  }
  func.func @transform_5(%arg0: i32) -> (i32, i32) {
    %c0_i32 = arith.constant 0 : i32
    %c0_i32_0 = arith.constant 0 : i32
    return %arg0, %c0_i32 : i32, i32
  }
}

module attributes {stable_mosaic.version = 11 : i64} {
  func.func @_adapter_kernel(%arg0: i32, %arg1: memref<8x32xf32, #tpu.memory_space<vmem>>, %arg2: memref<32x64xf32, #tpu.memory_space<vmem>>, %arg3: memref<1x64xf32, #tpu.memory_space<vmem>>, %arg4: memref<64x32xf32, #tpu.memory_space<vmem>>, %arg5: memref<1x32xf32, #tpu.memory_space<vmem>>, %arg6: memref<8x32xf32, #tpu.memory_space<vmem>>) attributes {dimension_semantics = [#tpu.dimension_semantics<parallel>], iteration_bounds = array<i64: 2>, scalar_prefetch = 0 : i64, scratch_operands = 0 : i64, tpu.core_type = #tpu.core_type<tc>, window_params = [{transform_indices = @transform_0, window_bounds = array<i64: 8, 32>}, {pipeline_mode = #tpu.pipeline_mode<synchronous>, transform_indices = @transform_1, window_bounds = array<i64: 32, 64>}, {pipeline_mode = #tpu.pipeline_mode<synchronous>, transform_indices = @transform_2, window_bounds = array<i64: 1, 64>}, {pipeline_mode = #tpu.pipeline_mode<synchronous>, transform_indices = @transform_3, window_bounds = array<i64: 64, 32>}, {pipeline_mode = #tpu.pipeline_mode<synchronous>, transform_indices = @transform_4, window_bounds = array<i64: 1, 32>}, {transform_indices = @transform_5, window_bounds = array<i64: 8, 32>}]} {
    %c0 = arith.constant 0 : index
    %c0_0 = arith.constant 0 : index
    %0 = vector.load %arg1[%c0, %c0_0] : memref<8x32xf32, #tpu.memory_space<vmem>>, vector<8x32xf32>
    %c0_1 = arith.constant 0 : index
    %c0_2 = arith.constant 0 : index
    %1 = vector.load %arg2[%c0_1, %c0_2] : memref<32x64xf32, #tpu.memory_space<vmem>>, vector<32x64xf32>
    %cst = arith.constant dense<0.000000e+00> : vector<8x64xf32>
    %2 = tpu.matmul %0, %1, %cst {dimension_numbers = #tpu.dot_dimension_numbers<[1], [0], [0], [1], [0, 0, 1, 1], [], []>} : vector<8x32xf32>, vector<32x64xf32>, vector<8x64xf32> -> vector<8x64xf32>
    %c0_3 = arith.constant 0 : index
    %c0_4 = arith.constant 0 : index
    %3 = vector.load %arg3[%c0_3, %c0_4] : memref<1x64xf32, #tpu.memory_space<vmem>>, vector<1x64xf32>
    %4 = vector.broadcast %3 : vector<1x64xf32> to vector<8x64xf32>
    %5 = arith.addf %2, %4 : vector<8x64xf32>
    %cst_5 = arith.constant 0.000000e+00 : f32
    %6 = vector.broadcast %cst_5 : f32 to vector<8x64xf32>
    %7 = arith.maximumf %5, %6 : vector<8x64xf32>
    %c0_6 = arith.constant 0 : index
    %c0_7 = arith.constant 0 : index
    %8 = vector.load %arg4[%c0_6, %c0_7] : memref<64x32xf32, #tpu.memory_space<vmem>>, vector<64x32xf32>
    %cst_8 = arith.constant dense<0.000000e+00> : vector<8x32xf32>
    %9 = tpu.matmul %7, %8, %cst_8 {dimension_numbers = #tpu.dot_dimension_numbers<[1], [0], [0], [1], [0, 0, 1, 1], [], []>} : vector<8x64xf32>, vector<64x32xf32>, vector<8x32xf32> -> vector<8x32xf32>
    %c0_9 = arith.constant 0 : index
    %c0_10 = arith.constant 0 : index
    %10 = vector.load %arg5[%c0_9, %c0_10] : memref<1x32xf32, #tpu.memory_space<vmem>>, vector<1x32xf32>
    %11 = vector.broadcast %10 : vector<1x32xf32> to vector<8x32xf32>
    %12 = arith.addf %9, %11 : vector<8x32xf32>
    %c0_11 = arith.constant 0 : index
    %c0_12 = arith.constant 0 : index
    %13 = vector.load %arg6[%c0_11, %c0_12] : memref<8x32xf32, #tpu.memory_space<vmem>>, vector<8x32xf32>
    tpu.vector_store %arg6[%c0_11, %c0_12], %12 {strides = array<i32>} : memref<8x32xf32, #tpu.memory_space<vmem>>, vector<8x32xf32>,
    return
  }
  func.func @transform_0(%arg0: i32) -> (i32, i32) {
    %c0_i32 = arith.constant 0 : i32
    %c0_i32_0 = arith.constant 0 : i32
    return %arg0, %c0_i32 : i32, i32
  }
  func.func @transform_1(%arg0: i32) -> (i32, i32) {
    %c0_i32 = arith.constant 0 : i32
    %c0_i32_0 = arith.constant 0 : i32
    %c0_i32_1 = arith.constant 0 : i32
    return %c0_i32, %c0_i32_0 : i32, i32
  }
  func.func @transform_2(%arg0: i32) -> (i32, i32) {
    %c0_i32 = arith.constant 0 : i32
    %c0_i32_0 = arith.constant 0 : i32
    %c0_i32_1 = arith.constant 0 : i32
    return %c0_i32, %c0_i32_0 : i32, i32
  }
  func.func @transform_3(%arg0: i32) -> (i32, i32) {
    %c0_i32 = arith.constant 0 : i32
    %c0_i32_0 = arith.constant 0 : i32
    %c0_i32_1 = arith.constant 0 : i32
    return %c0_i32, %c0_i32_0 : i32, i32
  }
  func.func @transform_4(%arg0: i32) -> (i32, i32) {
    %c0_i32 = arith.constant 0 : i32
    %c0_i32_0 = arith.constant 0 : i32
    %c0_i32_1 = arith.constant 0 : i32
    return %c0_i32, %c0_i32_0 : i32, i32
  }
  func.func @transform_5(%arg0: i32) -> (i32, i32) {
    %c0_i32 = arith.constant 0 : i32
    %c0_i32_0 = arith.constant 0 : i32
    return %arg0, %c0_i32 : i32, i32
  }
}

</mosaic_0001>

<bundles_post_ra>
// kernel: tpu_custom_call.1
= control target key start
LH: loop header
LB: loop body
LE: loop exit
PB: predicated region body
PF: predicated region fallthrough
CT: control target
= control target key end

     0   :  { %10 = vsyncpa [#allocation3], 0  ;;  %s803_s0 = inlined_call_operand.vmem [shape: f32[16,32], index: 0, kind: input, shape index: {}]   ;;  %s804_s1 = inlined_call_operand.vmem [shape: f32[32,64], index: 1, kind: input, shape index: {}]   ;;  %s805_s2 = inlined_call_operand.vmem [shape: f32[1,64], index: 2, kind: input, shape index: {}]   ;;  %s806_s3 = inlined_call_operand.vmem [shape: f32[64,32], index: 3, kind: input, shape index: {}]   ;;  %s807_s4 = inlined_call_operand.vmem [shape: f32[1,32], index: 4, kind: input, shape index: {}]   ;;  %s808_s5 = inlined_call_operand.hbm [shape: f32[16,32], index: 5, kind: output, shape index: {}]  }
   0x1   :  { %12 = vsyncpa [#allocation3 + $0x1], 0  ;;  %s664_s18 = smov 0   ;;  %s666_s19 = smov 0  }
   0x2   :  { %s668_s20 = smov 0   ;;  %s670_s21 = smov 0  }
   0x3 LB: > { %s685_s22 = sadd.s32 4294967295, %s629_s21   ;;  %s470_s23 = sadd.s32 4294967294, %s629_s21   ;;  %s629_s21 = sphi %s670_s21, %s814_s21   ;;  %s625_s20 = sphi %s668_s20, %s813_s20   ;;  %s621_s19 = sphi %s666_s19, %s812_s19   ;;  %s617_s18 = sphi %s664_s18, %s811_s18  }
   0x4   : > { %s689_s24 = sadd.s32 1, %s629_s21   ;;  %s135_s25 = sadd.s32 1, %s625_s20 }
   0x5   : > { %s132_s26 = ssub.s32 %s629_s21, %s689_s24  ;;  %p145_p0 = scmp.ne.s32.totalorder %s625_s20, %s621_s19 }
   0x6   : > { %p133_p1 = scmp.eq.s32.totalorder %s132_s26, 0  ;;  %p146_p2 = scmp.eq.s32.totalorder %s685_s22, 1 }
   0x7   : > { %p151_p3 = scmp.ne.s32.totalorder %s621_s19, %s617_s18  ;;  %p152_p4 = scmp.eq.s32.totalorder %s470_s23, 1 }
   0x8   : > { %s700_s27 = scalar_select %p133_p1, %s625_s20, %s135_s25  }
   0x9   : > { %p702_p5 = por %p146_p2, %p145_p0  ;;  %p706_p6 = por %p152_p4, %p151_p3 }
   0xa   : > { %p473_p7 = scmp.ge.s32.totalorder %s629_s21, 1  ;;  %p189_p8 = scmp.lt.s32.totalorder %s629_s21, 3 }
   0xc   : > { %p190_p9 = pnand %p473_p7, %p189_p8 }
   0xd   : > { %p216_p10 = scmp.lt.s32.totalorder (!%p190_p9), %s685_s22, 1  ;;  %s213_s26 = sand.u32 (!%p190_p9), 1, %s621_s19  }
   0xe   : > { %193 = sbr.rel (%p190_p9) target bundleno = 433 (0x1b1), region = 40  ;;  %s474_s30 = sshll.u32 (!%p190_p9), %s213_s26, 3 }
   0xf   : > { %s481_s8 = sshll.u32 (!%p190_p9), %s685_s22, 7  ;;  %s215_s9 = scalar_lea.vmem (!%p190_p9), [#allocation2], %s474_s30 }
  0x10   : > { %s411_s10 = sshll.u32 (!%p190_p9), %s215_s9, 4  ;;  %s767_s13 = scalar_lea.hbm (!%p190_p9), %s808_s5, %s481_s8  ;;  %s412_s10 = int_to_ptr.vmem [resolvable:$true] %s411_s10 }
  0x11   : > { %s398_s14 = scalar_lea.sflag (!%p190_p9), [#allocation3], %s213_s26  ;;  %s569_s15 = scalar_lea.vmem (!%p190_p9), %s412_s10, 128 }
  0x12   : > { %p570_p11 = scmp.ne.s32.totalorder (!%p190_p9), %s412_s10, %s569_s15 }
  0x13   : > { %v224_v0 = vld [vmem:[%s804_s1 + $0x18] sm:$0xff]  ;;  %v631_v1 = vmov 0.0   ;;  %v223_v2 = vld [vmem:[%s804_s1 + $0x10] sm:$0xff]  ;;  %vm632_vm0 = vmmov 0   ;;  %s217_s11 = scalar_select %p216_p10, %s685_s22, 1  ;;  %v222_v5 = vld [vmem:[%s804_s1 + $0x8] sm:$0xff] }
  0x14   : > { %498 = vmatprep.subr.mxu0 %v631_v1  ;;  %506 = vmatprep.mubr.msk.f32.mxu0 %vm632_vm0, %v631_v1  ;;  %v314_v3 = vld [vmem:[%s806_s3 + $0x38] sm:$0xff]  ;;  %v313_v4 = vld [vmem:[%s806_s3 + $0x30] sm:$0xff]  ;;  %v312_v6 = vld [vmem:[%s806_s3 + $0x28] sm:$0xff]  ;;  %vm232_vm1 = vcmask 261120   ;;  %vm322_vm2 = vcmask 523264   ;;  %p571_p12 = pnand %p570_p11, %p702_p5  ;;  %s633_s22 = smov [#allocation2]  }
  0x15   : > { %499 = vmatpush3.msra.mxu0 %v224_v0  ;;  %509 = vmatprep.subr.mxu1 %v631_v1  ;;  %s475_s16 = sshll.u32 %s217_s11, 3  ;;  %v221_v7 = vld [vmem:[%s804_s1] sm:$0xff]  ;;  %v310_v10 = vld [vmem:[%s806_s3 + $0x18] sm:$0xff]  ;;  %v309_v11 = vld [vmem:[%s806_s3 + $0x10] sm:$0xff] }
  0x16   : > { %500 = vmatprep.subr.mxu0 %v631_v1  ;;  %510 = vmatpush3.msra.mxu1 %v314_v3  ;;  %s219_s7 = scalar_lea.vmem %s803_s0, %s475_s16  ;;  %v311_v9 = vld [vmem:[%s806_s3 + $0x20] sm:$0xff]  ;;  %v308_v12 = vld [vmem:[%s806_s3 + $0x8] sm:$0xff]  ;;  %p572_p13 = pneg %p571_p12 }
  0x17   : > { %501 = vmatpush3.msra.mxu0 %v223_v2  ;;  %511 = vmatprep.subr.mxu1 %v631_v1  ;;  %v220_v8 = vld [vmem:[%s219_s7] sm:$0xff]  ;;  %s573_s16 = sshll.u32 %s633_s22, 4  ;;  %s574_s16 = int_to_ptr.vmem [resolvable:$false] %s573_s16 }
  0x18   : > { %502 = vmatprep.subr.mxu0 %v631_v1  ;;  %512 = vmatpush3.msra.mxu1 %v313_v4  ;;  %v307_v13 = vld [vmem:[%s806_s3] sm:$0xff]  ;;  %s575_s17 = scalar_lea.vmem %s574_s16, 256  ;;  %p576_p0 = scmp.lt.s32.totalorder %s412_s10, %s574_s16 }
  0x19   : > { %503 = vmatpush3.msra.mxu0 %v222_v5  ;;  %513 = vmatprep.subr.mxu1 %v631_v1  ;;  %v476_v14 = vld [vmem:[%s805_s2] ss:$0 sm:$0xff]  ;;  %p577_p1 = scmp.lt.s32.totalorder %s575_s17, %s569_s15 }
  0x1a   : > { %504 = vmatprep.subr.mxu0 %v631_v1  ;;  %514 = vmatpush3.msra.mxu1 %v312_v6  ;;  %v478_v19 = vld [vmem:[%s807_s4] ss:$0 sm:$0xff] }
  0x1b   : > { %505 = vmatpush3.msra.mxu0 %v221_v7  ;;  %515 = vmatprep.subr.mxu1 %v631_v1  ;;  %p578_p2 = por %p577_p1, %p576_p0 }
  0x1c   : > { %507 = vmatmul.mubr.msk.f32.vlgmr.msra.gmra.mxu0 %vm232_vm1, %v220_v8  ;;  %516 = vmatpush3.msra.mxu1 %v311_v9 }
  0x1d   : > { %517 = vmatprep.subr.mxu1 %v631_v1  ;;  %525 = vmatprep.mubr.msk.f32.mxu1 %vm632_vm0, %v631_v1  ;;  %p579_p3 = pnand %p578_p2, %p572_p13 }
  0x1e   : > { %518 = vmatpush3.msra.mxu1 %v310_v10 }
  0x1f   : > { %519 = vmatprep.subr.mxu1 %v631_v1 }
  0x20   : > { %520 = vmatpush3.msra.mxu1 %v309_v11 }
  0x21   : > { %521 = vmatprep.subr.mxu1 %v631_v1 }
  0x22   : > { %522 = vmatpush3.msra.mxu1 %v308_v12 }
  0x23   : > { %523 = vmatprep.subr.mxu1 %v631_v1 }
  0x24   : > { %524 = vmatpush3.msra.mxu1 %v307_v13 }
  0xdc   : > { %v302_v15 = vpop.f32.mrf.mxu0 }
  0xdd   : > { %v303_v16 = vadd.f32 %v476_v14, %v302_v15 }
  0xde   : > { %v508_v17 = vpop.f32.mrf.mxu0 }
  0xdf   : > { %v306_v18 = vmax.f32 %v303_v16, 0.0 }
  0xe1   : > { %526 = vmatmul.mubr.msk.f32.vlgmr.msra.gmra.mxu1 %vm322_vm2, %v306_v18 }
 0x1a1   : > { %v392_v20 = vpop.f32.mrf.mxu1 }
 0x1a2   : > { %v393_v21 = vadd.f32 %v478_v19, %v392_v20 }
 0x1a3   : > { %v527_v22 = vpop.f32.mrf.mxu1 }
 0x1a4   : > { %396 = vst.msk [vmem:[%s215_s9] sm:$0xff] %vm232_vm1, %v393_v21 }
 0x1a5   : > { %582 = shalt.err (!%p579_p3)
}
 0x1a6   : > { %s583_s23 = scalar_lea.hbm %s767_s13, 128  ;;  %s587_s30 = scalar_lea.hbm %s808_s5, 256 }
 0x1a7   : > { %p584_p4 = scmp.ne.s32.totalorder %s767_s13, %s583_s23  ;;  %p588_p9 = scmp.lt.s32.totalorder %s767_s13, %s808_s5 }
 0x1a8   : > { %p589_p10 = scmp.lt.s32.totalorder %s587_s30, %s583_s23 }
 0x1a9   : > { %p585_p7 = pnand %p584_p4, %p702_p5 }
 0x1aa   : > { %p590_p11 = por %p589_p10, %p588_p9 }
 0x1ab   : > { %p586_p8 = pneg %p585_p7 }
 0x1ad   : > { %p591_p12 = pnand %p590_p11, %p586_p8 }
 0x1af   : > { %594 = shalt.err (!%p591_p12)
}
 0x1b0   : > { %528 = dma.vmem_to_hbm [thread:$0]  (%p702_p5), %s412_s10, 128, %s767_s13, %s398_s14  }
 0x1b1 PF: > { %p534_p13 = scmp.ge.s32.totalorder %s629_s21, 2  ;;  %s423_s8 = sand.u32 1, %s617_s18  }
 0x1b2   : > { %s424_s9 = scalar_lea.sflag [#allocation3], %s423_s8 }
 0x1b3   : > { %p531_p0 = pnand %p534_p13, %p706_p6 }
 0x1b5   : > { %p532_p1 = pneg %p531_p0 }
 0x1b7   : > { %612 = dma.done.wait (%p532_p1), %s424_s9, 128  }
 0x1b8   : > { %614 = vsyncadd (%p532_p1), %s424_s9, 4294967168  ;;  %p15_p2 = scmp.ge.s32.totalorder %s689_s24, 4   ;;  %s811_s18 = smov %s621_s19 }
 0x1b9   : > { %s812_s19 = smov %s625_s20  ;;  %s813_s20 = smov %s700_s27 }
 0x1ba   : > { %s814_s21 = smov %s689_s24  ;;  %17 = sbr.rel (!%p15_p2) target bundleno = 3 (0x3), region = 75 }
 0x1bf   :  { %429 = vsyncpa [#allocation3], 1 }
 0x1c0   :  { %431 = vsyncpa [#allocation3 + $0x1], 1 }

// kernel: tpu_custom_call.1
= control target key start
LH: loop header
LB: loop body
LE: loop exit
PB: predicated region body
PF: predicated region fallthrough
CT: control target
= control target key end

     0   :  { %10 = vsyncpa [#allocation3], 0  ;;  %s803_s0 = inlined_call_operand.vmem [shape: f32[16,32], index: 0, kind: input, shape index: {}]   ;;  %s804_s1 = inlined_call_operand.vmem [shape: f32[32,64], index: 1, kind: input, shape index: {}]   ;;  %s805_s2 = inlined_call_operand.vmem [shape: f32[1,64], index: 2, kind: input, shape index: {}]   ;;  %s806_s3 = inlined_call_operand.vmem [shape: f32[64,32], index: 3, kind: input, shape index: {}]   ;;  %s807_s4 = inlined_call_operand.vmem [shape: f32[1,32], index: 4, kind: input, shape index: {}]   ;;  %s808_s5 = inlined_call_operand.hbm [shape: f32[16,32], index: 5, kind: output, shape index: {}]  }
   0x1   :  { %12 = vsyncpa [#allocation3 + $0x1], 0  ;;  %s664_s18 = smov 0   ;;  %s666_s19 = smov 0  }
   0x2   :  { %s668_s20 = smov 0   ;;  %s670_s21 = smov 0  }
   0x3 LB: > { %s685_s22 = sadd.s32 4294967295, %s629_s21   ;;  %s470_s23 = sadd.s32 4294967294, %s629_s21   ;;  %s629_s21 = sphi %s670_s21, %s814_s21   ;;  %s625_s20 = sphi %s668_s20, %s813_s20   ;;  %s621_s19 = sphi %s666_s19, %s812_s19   ;;  %s617_s18 = sphi %s664_s18, %s811_s18  }
   0x4   : > { %s689_s24 = sadd.s32 1, %s629_s21   ;;  %s135_s25 = sadd.s32 1, %s625_s20 }
   0x5   : > { %s132_s26 = ssub.s32 %s629_s21, %s689_s24  ;;  %p145_p0 = scmp.ne.s32.totalorder %s625_s20, %s621_s19 }
   0x6   : > { %p133_p1 = scmp.eq.s32.totalorder %s132_s26, 0  ;;  %p146_p2 = scmp.eq.s32.totalorder %s685_s22, 1 }
   0x7   : > { %p151_p3 = scmp.ne.s32.totalorder %s621_s19, %s617_s18  ;;  %p152_p4 = scmp.eq.s32.totalorder %s470_s23, 1 }
   0x8   : > { %s700_s27 = scalar_select %p133_p1, %s625_s20, %s135_s25  }
   0x9   : > { %p702_p5 = por %p146_p2, %p145_p0  ;;  %p706_p6 = por %p152_p4, %p151_p3 }
   0xa   : > { %p473_p7 = scmp.ge.s32.totalorder %s629_s21, 1  ;;  %p189_p8 = scmp.lt.s32.totalorder %s629_s21, 3 }
   0xc   : > { %p190_p9 = pnand %p473_p7, %p189_p8 }
   0xd   : > { %p216_p10 = scmp.lt.s32.totalorder (!%p190_p9), %s685_s22, 1  ;;  %s213_s26 = sand.u32 (!%p190_p9), 1, %s621_s19  }
   0xe   : > { %193 = sbr.rel (%p190_p9) target bundleno = 433 (0x1b1), region = 40  ;;  %s474_s30 = sshll.u32 (!%p190_p9), %s213_s26, 3 }
   0xf   : > { %s481_s8 = sshll.u32 (!%p190_p9), %s685_s22, 7  ;;  %s215_s9 = scalar_lea.vmem (!%p190_p9), [#allocation2], %s474_s30 }
  0x10   : > { %s411_s10 = sshll.u32 (!%p190_p9), %s215_s9, 4  ;;  %s767_s13 = scalar_lea.hbm (!%p190_p9), %s808_s5, %s481_s8  ;;  %s412_s10 = int_to_ptr.vmem [resolvable:$true] %s411_s10 }
  0x11   : > { %s398_s14 = scalar_lea.sflag (!%p190_p9), [#allocation3], %s213_s26  ;;  %s569_s15 = scalar_lea.vmem (!%p190_p9), %s412_s10, 128 }
  0x12   : > { %p570_p11 = scmp.ne.s32.totalorder (!%p190_p9), %s412_s10, %s569_s15 }
  0x13   : > { %v224_v0 = vld [vmem:[%s804_s1 + $0x18] sm:$0xff]  ;;  %v631_v1 = vmov 0.0   ;;  %v223_v2 = vld [vmem:[%s804_s1 + $0x10] sm:$0xff]  ;;  %vm632_vm0 = vmmov 0   ;;  %s217_s11 = scalar_select %p216_p10, %s685_s22, 1  ;;  %v222_v5 = vld [vmem:[%s804_s1 + $0x8] sm:$0xff] }
  0x14   : > { %498 = vmatprep.subr.mxu0 %v631_v1  ;;  %506 = vmatprep.mubr.msk.f32.mxu0 %vm632_vm0, %v631_v1  ;;  %v314_v3 = vld [vmem:[%s806_s3 + $0x38] sm:$0xff]  ;;  %v313_v4 = vld [vmem:[%s806_s3 + $0x30] sm:$0xff]  ;;  %v312_v6 = vld [vmem:[%s806_s3 + $0x28] sm:$0xff]  ;;  %vm232_vm1 = vcmask 261120   ;;  %vm322_vm2 = vcmask 523264   ;;  %p571_p12 = pnand %p570_p11, %p702_p5  ;;  %s633_s22 = smov [#allocation2]  }
  0x15   : > { %499 = vmatpush3.msra.mxu0 %v224_v0  ;;  %509 = vmatprep.subr.mxu1 %v631_v1  ;;  %s475_s16 = sshll.u32 %s217_s11, 3  ;;  %v221_v7 = vld [vmem:[%s804_s1] sm:$0xff]  ;;  %v310_v10 = vld [vmem:[%s806_s3 + $0x18] sm:$0xff]  ;;  %v309_v11 = vld [vmem:[%s806_s3 + $0x10] sm:$0xff] }
  0x16   : > { %500 = vmatprep.subr.mxu0 %v631_v1  ;;  %510 = vmatpush3.msra.mxu1 %v314_v3  ;;  %s219_s7 = scalar_lea.vmem %s803_s0, %s475_s16  ;;  %v311_v9 = vld [vmem:[%s806_s3 + $0x20] sm:$0xff]  ;;  %v308_v12 = vld [vmem:[%s806_s3 + $0x8] sm:$0xff]  ;;  %p572_p13 = pneg %p571_p12 }
  0x17   : > { %501 = vmatpush3.msra.mxu0 %v223_v2  ;;  %511 = vmatprep.subr.mxu1 %v631_v1  ;;  %v220_v8 = vld [vmem:[%s219_s7] sm:$0xff]  ;;  %s573_s16 = sshll.u32 %s633_s22, 4  ;;  %s574_s16 = int_to_ptr.vmem [resolvable:$false] %s573_s16 }
  0x18   : > { %502 = vmatprep.subr.mxu0 %v631_v1  ;;  %512 = vmatpush3.msra.mxu1 %v313_v4  ;;  %v307_v13 = vld [vmem:[%s806_s3] sm:$0xff]  ;;  %s575_s17 = scalar_lea.vmem %s574_s16, 256  ;;  %p576_p0 = scmp.lt.s32.totalorder %s412_s10, %s574_s16 }
  0x19   : > { %503 = vmatpush3.msra.mxu0 %v222_v5  ;;  %513 = vmatprep.subr.mxu1 %v631_v1  ;;  %v476_v14 = vld [vmem:[%s805_s2] ss:$0 sm:$0xff]  ;;  %p577_p1 = scmp.lt.s32.totalorder %s575_s17, %s569_s15 }
  0x1a   : > { %504 = vmatprep.subr.mxu0 %v631_v1  ;;  %514 = vmatpush3.msra.mxu1 %v312_v6  ;;  %v478_v19 = vld [vmem:[%s807_s4] ss:$0 sm:$0xff] }
  0x1b   : > { %505 = vmatpush3.msra.mxu0 %v221_v7  ;;  %515 = vmatprep.subr.mxu1 %v631_v1  ;;  %p578_p2 = por %p577_p1, %p576_p0 }
  0x1c   : > { %507 = vmatmul.mubr.msk.f32.vlgmr.msra.gmra.mxu0 %vm232_vm1, %v220_v8  ;;  %516 = vmatpush3.msra.mxu1 %v311_v9 }
  0x1d   : > { %517 = vmatprep.subr.mxu1 %v631_v1  ;;  %525 = vmatprep.mubr.msk.f32.mxu1 %vm632_vm0, %v631_v1  ;;  %p579_p3 = pnand %p578_p2, %p572_p13 }
  0x1e   : > { %518 = vmatpush3.msra.mxu1 %v310_v10 }
  0x1f   : > { %519 = vmatprep.subr.mxu1 %v631_v1 }
  0x20   : > { %520 = vmatpush3.msra.mxu1 %v309_v11 }
  0x21   : > { %521 = vmatprep.subr.mxu1 %v631_v1 }
  0x22   : > { %522 = vmatpush3.msra.mxu1 %v308_v12 }
  0x23   : > { %523 = vmatprep.subr.mxu1 %v631_v1 }
  0x24   : > { %524 = vmatpush3.msra.mxu1 %v307_v13 }
  0xdc   : > { %v302_v15 = vpop.f32.mrf.mxu0 }
  0xdd   : > { %v303_v16 = vadd.f32 %v476_v14, %v302_v15 }
  0xde   : > { %v508_v17 = vpop.f32.mrf.mxu0 }
  0xdf   : > { %v306_v18 = vmax.f32 %v303_v16, 0.0 }
  0xe1   : > { %526 = vmatmul.mubr.msk.f32.vlgmr.msra.gmra.mxu1 %vm322_vm2, %v306_v18 }
 0x1a1   : > { %v392_v20 = vpop.f32.mrf.mxu1 }
 0x1a2   : > { %v393_v21 = vadd.f32 %v478_v19, %v392_v20 }
 0x1a3   : > { %v527_v22 = vpop.f32.mrf.mxu1 }
 0x1a4   : > { %396 = vst.msk [vmem:[%s215_s9] sm:$0xff] %vm232_vm1, %v393_v21 }
 0x1a5   : > { %582 = shalt.err (!%p579_p3)
}
 0x1a6   : > { %s583_s23 = scalar_lea.hbm %s767_s13, 128  ;;  %s587_s30 = scalar_lea.hbm %s808_s5, 256 }
 0x1a7   : > { %p584_p4 = scmp.ne.s32.totalorder %s767_s13, %s583_s23  ;;  %p588_p9 = scmp.lt.s32.totalorder %s767_s13, %s808_s5 }
 0x1a8   : > { %p589_p10 = scmp.lt.s32.totalorder %s587_s30, %s583_s23 }
 0x1a9   : > { %p585_p7 = pnand %p584_p4, %p702_p5 }
 0x1aa   : > { %p590_p11 = por %p589_p10, %p588_p9 }
 0x1ab   : > { %p586_p8 = pneg %p585_p7 }
 0x1ad   : > { %p591_p12 = pnand %p590_p11, %p586_p8 }
 0x1af   : > { %594 = shalt.err (!%p591_p12)
}
 0x1b0   : > { %528 = dma.vmem_to_hbm [thread:$0]  (%p702_p5), %s412_s10, 128, %s767_s13, %s398_s14  }
 0x1b1 PF: > { %p534_p13 = scmp.ge.s32.totalorder %s629_s21, 2  ;;  %s423_s8 = sand.u32 1, %s617_s18  }
 0x1b2   : > { %s424_s9 = scalar_lea.sflag [#allocation3], %s423_s8 }
 0x1b3   : > { %p531_p0 = pnand %p534_p13, %p706_p6 }
 0x1b5   : > { %p532_p1 = pneg %p531_p0 }
 0x1b7   : > { %612 = dma.done.wait (%p532_p1), %s424_s9, 128  }
 0x1b8   : > { %614 = vsyncadd (%p532_p1), %s424_s9, 4294967168  ;;  %p15_p2 = scmp.ge.s32.totalorder %s689_s24, 4   ;;  %s811_s18 = smov %s621_s19 }
 0x1b9   : > { %s812_s19 = smov %s625_s20  ;;  %s813_s20 = smov %s700_s27 }
 0x1ba   : > { %s814_s21 = smov %s689_s24  ;;  %17 = sbr.rel (!%p15_p2) target bundleno = 3 (0x3), region = 75 }
 0x1bf   :  { %429 = vsyncpa [#allocation3], 1 }
 0x1c0   :  { %431 = vsyncpa [#allocation3 + $0x1], 1 }

</bundles_post_ra>
